<compile_context>
chip_gen: v6e
topology: v6e:2x2x1
jax: 0.10.0
libtpu: 0.0.40
codegen_flags: <defaults>
</compile_context>

<pallas_src>
import functools

import jax
import jax.numpy as jnp
from jax.experimental import pallas as pl


def _identity_noop_kernel(x_ref, o_ref):
    # Output aliases the input HBM buffer; there is nothing to compute or move.
    # Intentionally empty: no DMA, no vector ops, zero HBM traffic.
    del x_ref, o_ref


@functools.partial(jax.jit, donate_argnums=(0,))
def identity(x: jax.Array) -> jax.Array:
    """Pallas implementation of Identity.forward: returns x unchanged (zero-copy)."""
    if x.size == 0:
        # Degenerate empty tensor: nothing to do.
        return x

    return pl.pallas_call(
        _identity_noop_kernel,
        out_shape=jax.ShapeDtypeStruct(x.shape, x.dtype),
        # Raw HBM refs on both sides: Pallas emits no HBM<->VMEM DMA.
        in_specs=[pl.BlockSpec(memory_space=pl.ANY)],
        out_specs=pl.BlockSpec(memory_space=pl.ANY),
        # Alias input 0 -> output 0: the result is the (donated) input buffer.
        input_output_aliases={0: 0},
        # Advisory: this call does no work; let XLA schedule around it freely.
        cost_estimate=pl.CostEstimate(flops=0, transcendentals=0, bytes_accessed=0),
    )(x)


if __name__ == "__main__":
    key = jax.random.PRNGKey(0)
    # NCHW input, consistent with a ResNet18-style classifier (Identity skip branch).
    shape, dtype = (2, 4, 16, 16), jnp.float32
    x = jax.random.normal(key, shape, dtype=dtype)

    y = identity(x)  # x's device buffer is donated and aliased to y.
    jax.block_until_ready(y)

    # x was donated, so verify against a deterministic regeneration of the same values.
    x_expected = jax.random.normal(jax.random.PRNGKey(0), shape, dtype=dtype)

    assert y.shape == shape and y.dtype == jnp.dtype(dtype)
    assert bool(jnp.all(y == x_expected))

    print("KERNEL_OK")
</pallas_src>

<mosaic_0001>
module attributes {stable_mosaic.version = 11 : i64} {
  func.func @_identity_noop_kernel(%arg0: memref<2x4x16x16xf32, #tpu.memory_space<any>>, %arg1: memref<2x4x16x16xf32, #tpu.memory_space<any>>) attributes {dimension_semantics = [], scalar_prefetch = 0 : i64, scratch_operands = 0 : i64, tpu.core_type = #tpu.core_type<tc>} {
    return
  }
}

</mosaic_0001>

<bundles_post_ra>
// kernel: identity.1
= control target key start
LH: loop header
LB: loop body
LE: loop exit
PB: predicated region body
PF: predicated region fallthrough
CT: control target
= control target key end

     0   :  { %s16_s0 = inlined_call_operand.hbm [shape: f32[2,4,16,16], index: 0, kind: input, shape index: {}, may-alias: {0,1}]   ;;  %s17_s1 = inlined_call_operand.hbm [shape: f32[2,4,16,16], index: 1, kind: output, shape index: {}, may-alias: {0,1}]  }

</bundles_post_ra>
